<compile_context>
chip_gen: v5e
topology: v5e:2x2
jax: 0.10.0
libtpu: 0.0.40
codegen_flags: <defaults>
</compile_context>

<pallas_src>
import functools

import jax
import jax.numpy as jnp
from jax.experimental import pallas as pl
from jax.experimental.pallas import tpu as pltpu


# --------------------------------------------------------------------------- #
# Cache construction (matches the torch module's rope_init / build_rope_cache) #
# --------------------------------------------------------------------------- #
def build_rope_cache(dim: int, max_seq_len: int, base: int = 10000):
    theta = 1.0 / (base ** (jnp.arange(0, dim, 2)[: dim // 2].astype(jnp.float32) / dim))
    seq_idx = jnp.arange(max_seq_len, dtype=jnp.float32)
    idx_theta = seq_idx[:, None] * theta[None, :]
    return jnp.cos(idx_theta), jnp.sin(idx_theta)  # each: (max_seq_len, dim // 2)


def fold_rope_coeffs(cos, sin):
    """Precompute ONCE at model init: parity/sign-folded f32 slabs, shape (L, dim).

    cos_f : [c0, c0, c1, c1, ...]
    sin_ev: [-s0, 0, -s1, 0, ...]   (hits even lanes only)
    sin_od: [ 0, s0,  0, s1, ...]   (hits odd lanes only)
    Kept in f32 to match the torch reference's x.float() upcast.
    """
    L, half = cos.shape
    zeros = jnp.zeros_like(sin)
    cos_f = jnp.stack([cos, cos], axis=-1).reshape(L, 2 * half)
    sin_ev = jnp.stack([-sin, zeros], axis=-1).reshape(L, 2 * half)
    sin_od = jnp.stack([zeros, sin], axis=-1).reshape(L, 2 * half)
    return (cos_f.astype(jnp.float32),
            sin_ev.astype(jnp.float32),
            sin_od.astype(jnp.float32))


# --------------------------------------------------------------------------- #
# Kernel                                                                        #
# --------------------------------------------------------------------------- #
def _rope_kernel(x_ref, c_ref, se_ref, so_ref, o_ref, *, n_h):
    # x_ref / o_ref: (rows, n_h*h_d) in x dtype ; coef refs: (rows, h_d) f32
    x = x_ref[...].astype(jnp.float32)
    cols = x.shape[-1]

    def bcast(r):  # lane-direction replication across heads (vreg copy, no shuffle math)
        v = r[...]
        return v if n_h == 1 else jnp.concatenate([v] * n_h, axis=-1)

    c, se, so = bcast(c_ref), bcast(se_ref), bcast(so_ref)

    # Pair swap on the XLU: x[j+1] at j / x[j-1] at j.  Wrap-around lanes are
    # killed by the zero-interleaved sin slabs, so no select/mask is needed.
    nxt = pltpu.roll(x, shift=cols - 1, axis=1)
    prv = pltpu.roll(x, shift=1, axis=1)

    #   out[2i]   = x[2i]*cos_i - x[2i+1]*sin_i
    #   out[2i+1] = x[2i+1]*cos_i + x[2i]*sin_i
    o_ref[...] = (x * c + nxt * se + prv * so).astype(o_ref.dtype)


# --------------------------------------------------------------------------- #
# Tiling helpers                                                                #
# --------------------------------------------------------------------------- #
def _sublane_multiple(dtype):
    # sub-32-bit dtypes pack along sublanes: keep row tiles densely packed
    return {4: 8, 2: 16, 1: 32}.get(jnp.dtype(dtype).itemsize, 8)


def _vmem_limit_bytes():
    vmem = 128 << 20
    try:
        vmem = int(pltpu.get_tpu_info().vmem_capacity_bytes)
    except Exception:
        pass  # fall back to v5e/v6e physical size
    # 48 MiB on v5e/v6e (128 MiB physical), 32 MiB on v7x (64 MiB physical)
    return int(min(48 << 20, vmem // 2))


def _pick_row_tile(rows, sub_mult, per_row_bytes, x_per_row_bytes,
                   vmem_budget, x_block_target, min_blocks):
    """Rows per block: multiple of sub_mult, fits the double-buffered VMEM budget."""
    if rows < sub_mult:
        return rows  # tiny (decode): a single full-extent block
    cap = (rows // sub_mult) * sub_mult
    cap = min(cap, max(sub_mult, (vmem_budget // (2 * per_row_bytes)) // sub_mult * sub_mult))
    cap = min(cap, max(sub_mult, (x_block_target // x_per_row_bytes) // sub_mult * sub_mult))
    # Prefer an exactly-dividing tile when it is within 2x of the cap; otherwise
    # take the cap and let Pallas mask the tail block (cdiv grid).
    best_div, d = 0, sub_mult
    while d <= cap:
        if rows % d == 0:
            best_div = d
        d += sub_mult
    t = best_div if best_div * 2 >= cap else cap
    # Make sure dual-TC parts (v7x) get >=2 blocks of work when possible.
    if pl.cdiv(rows, t) < min_blocks and t > sub_mult:
        t = max(sub_mult, ((pl.cdiv(rows, min_blocks) + sub_mult - 1) // sub_mult) * sub_mult)
    return t


# --------------------------------------------------------------------------- #
# Forward wrapper (== RotaryPositionalEmbeddings.forward)                      #
# --------------------------------------------------------------------------- #
def rotary_positional_embeddings(x, cos_f, sin_ev, sin_od, *,
                                 input_pos=None, donate_x=False):
    """x: [b, s, n_h, h_d]; cos_f/sin_ev/sin_od: folded (max_seq_len, h_d) f32 slabs."""
    b, s, n_h, h_d = x.shape
    assert h_d % 2 == 0, "RoPE requires an even head dim"
    cols = n_h * h_d
    isz = jnp.dtype(x.dtype).itemsize
    sub_mult = _sublane_multiple(x.dtype)

    vmem_limit = _vmem_limit_bytes()
    vmem_budget = (vmem_limit * 3) // 4          # headroom for compiler scratch
    x_block_target = 4 << 20                     # ~roofline-saturating block size
    per_row_bytes = 2 * cols * isz + 3 * h_d * 4  # x-in + x-out + 3 f32 coef rows

    # Coefficient rows: tiny vs. x, gathered/sliced outside the kernel.
    if input_pos is None:
        cc, cse, cso = cos_f[:s], sin_ev[:s], sin_od[:s]           # (s, h_d)
        coef_batched = False
    else:
        pos = jnp.asarray(input_pos)
        cc, cse, cso = cos_f[pos], sin_ev[pos], sin_od[pos]        # (s,h_d) or (b,s,h_d)
        coef_batched = pos.ndim == 2

    kernel = functools.partial(_rope_kernel, n_h=n_h)
    aliases = {0: 0} if donate_x else {}

    if s >= sub_mult:
        # ---- training / prefill path: tile the sequence; batch on the inner grid
        # axis so coefficient blocks are reused (not re-DMA'd) across batch steps.
        x2 = x.reshape(b, s, cols)               # contiguous collapse, no data movement
        t = _pick_row_tile(s, sub_mult, per_row_bytes, cols * isz,
                           vmem_budget, x_block_target,
                           min_blocks=2 if b == 1 else 1)
        grid = (pl.cdiv(s, t), b)
        x_spec = pl.BlockSpec((None, t, cols), lambda si, bi: (bi, si, 0))
        if coef_batched:
            coef_spec = pl.BlockSpec((None, t, h_d), lambda si, bi: (bi, si, 0))
        else:
            coef_spec = pl.BlockSpec((t, h_d), lambda si, bi: (si, 0))

        out = pl.pallas_call(
            kernel,
            out_shape=jax.ShapeDtypeStruct((b, s, cols), x.dtype),
            grid_spec=pltpu.PrefetchScalarGridSpec(
                num_scalar_prefetch=0,
                grid=grid,
                in_specs=[x_spec, coef_spec, coef_spec, coef_spec],
                out_specs=x_spec,
            ),
            compiler_params=pltpu.CompilerParams(
                dimension_semantics=("parallel", "parallel"),
                vmem_limit_bytes=vmem_limit),
            input_output_aliases=aliases,
        )(x2, cc, cse, cso)
    else:
        # ---- decode / tiny-s path: flatten (b, s) into one lane/sublane-dense
        # row axis instead of 1-row tiles per batch element.
        rows = b * s
        x2 = x.reshape(rows, cols)
        if coef_batched:
            cc2, cse2, cso2 = (a.reshape(rows, h_d) for a in (cc, cse, cso))
        else:
            cc2, cse2, cso2 = (jnp.broadcast_to(a[None], (b, s, h_d)).reshape(rows, h_d)
                               for a in (cc, cse, cso))
        t = _pick_row_tile(rows, sub_mult, per_row_bytes, cols * isz,
                           vmem_budget, x_block_target, min_blocks=2)
        grid = (pl.cdiv(rows, t),)
        x_spec = pl.BlockSpec((t, cols), lambda i: (i, 0))
        coef_spec = pl.BlockSpec((t, h_d), lambda i: (i, 0))

        out = pl.pallas_call(
            kernel,
            out_shape=jax.ShapeDtypeStruct((rows, cols), x.dtype),
            grid_spec=pltpu.PrefetchScalarGridSpec(
                num_scalar_prefetch=0,
                grid=grid,
                in_specs=[x_spec, coef_spec, coef_spec, coef_spec],
                out_specs=x_spec,
            ),
            compiler_params=pltpu.CompilerParams(
                dimension_semantics=("parallel",),
                vmem_limit_bytes=vmem_limit),
            input_output_aliases=aliases,
        )(x2, cc2, cse2, cso2)

    return out.reshape(b, s, n_h, h_d)


# --------------------------------------------------------------------------- #
# Pure-JAX reference (mirrors the PyTorch forward exactly)                     #
# --------------------------------------------------------------------------- #
def rope_ref(x, cos_cache, sin_cache, input_pos=None):
    b, s, n_h, h_d = x.shape
    xs = x.astype(jnp.float32).reshape(b, s, n_h, h_d // 2, 2)
    if input_pos is None:
        c, si = cos_cache[:s], sin_cache[:s]
        c, si = c[None, :, None, :], si[None, :, None, :]
    else:
        pos = jnp.asarray(input_pos)
        c, si = cos_cache[pos], sin_cache[pos]
        if pos.ndim == 1:
            c, si = c[None, :, None, :], si[None, :, None, :]
        else:
            c, si = c[:, :, None, :], si[:, :, None, :]
    out = jnp.stack([xs[..., 0] * c - xs[..., 1] * si,
                     xs[..., 1] * c + xs[..., 0] * si], axis=-1)
    return out.reshape(b, s, n_h, h_d).astype(x.dtype)


if __name__ == "__main__":
    head_dim, max_seq_len, base = 32, 64, 10000
    cos_cache, sin_cache = build_rope_cache(head_dim, max_seq_len, base)
    cos_f, sin_ev, sin_od = fold_rope_coeffs(cos_cache, sin_cache)   # precomputed once

    key = jax.random.PRNGKey(0)
    k1, k2, k3 = jax.random.split(key, 3)

    # 1) training/prefill path: [b, s, n_h, h_d] = [2, 8, 4, 32]
    x1 = jax.random.normal(k1, (2, 8, 4, head_dim), dtype=jnp.float32)
    o1 = jax.block_until_ready(rotary_positional_embeddings(x1, cos_f, sin_ev, sin_od))
    r1 = rope_ref(x1, cos_cache, sin_cache)
    assert o1.shape == x1.shape and o1.dtype == x1.dtype
    assert jnp.allclose(o1, r1, atol=1e-5, rtol=1e-5), "mismatch (prefill path)"

    # 2) sequence not divisible by the tile (masked tail block): [1, 20, 4, 32]
    x2 = jax.random.normal(k2, (1, 20, 4, head_dim), dtype=jnp.float32)
    o2 = jax.block_until_ready(rotary_positional_embeddings(x2, cos_f, sin_ev, sin_od))
    r2 = rope_ref(x2, cos_cache, sin_cache)
    assert jnp.allclose(o2, r2, atol=1e-5, rtol=1e-5), "mismatch (masked-tail path)"

    # 3) decode path with KV-cache position offsets: [2, 1, 4, 32], input_pos (b, s)
    x3 = jax.random.normal(k3, (2, 1, 4, head_dim), dtype=jnp.float32)
    pos = jnp.array([[5], [11]], dtype=jnp.int32)
    o3 = jax.block_until_ready(
        rotary_positional_embeddings(x3, cos_f, sin_ev, sin_od, input_pos=pos))
    r3 = rope_ref(x3, cos_cache, sin_cache, input_pos=pos)
    assert jnp.allclose(o3, r3, atol=1e-5, rtol=1e-5), "mismatch (decode path)"

    print("KERNEL_OK")
</pallas_src>

<mosaic_0001>
module attributes {stable_mosaic.version = 11 : i64} {
  func.func @_rope_kernel(%arg0: i32, %arg1: i32, %arg2: memref<1x8x128xf32, #tpu.memory_space<vmem>>, %arg3: memref<8x32xf32, #tpu.memory_space<vmem>>, %arg4: memref<8x32xf32, #tpu.memory_space<vmem>>, %arg5: memref<8x32xf32, #tpu.memory_space<vmem>>, %arg6: memref<1x8x128xf32, #tpu.memory_space<vmem>>) attributes {dimension_semantics = [#tpu.dimension_semantics<parallel>, #tpu.dimension_semantics<parallel>], iteration_bounds = array<i64: 1, 2>, scalar_prefetch = 0 : i64, scratch_operands = 0 : i64, tpu.core_type = #tpu.core_type<tc>, window_params = [{transform_indices = @transform_0, window_bounds = array<i64: 1, 8, 128>}, {transform_indices = @transform_1, window_bounds = array<i64: 8, 32>}, {transform_indices = @transform_2, window_bounds = array<i64: 8, 32>}, {transform_indices = @transform_3, window_bounds = array<i64: 8, 32>}, {transform_indices = @transform_4, window_bounds = array<i64: 1, 8, 128>}]} {
    %c0 = arith.constant 0 : index
    %c0_0 = arith.constant 0 : index
    %c0_1 = arith.constant 0 : index
    %0 = vector.load %arg2[%c0, %c0_0, %c0_1] : memref<1x8x128xf32, #tpu.memory_space<vmem>>, vector<1x8x128xf32>
    %1 = vector.shape_cast %0 : vector<1x8x128xf32> to vector<8x128xf32>
    %c0_2 = arith.constant 0 : index
    %c0_3 = arith.constant 0 : index
    %2 = vector.load %arg3[%c0_2, %c0_3] : memref<8x32xf32, #tpu.memory_space<vmem>>, vector<8x32xf32>
    %3 = tpu.concatenate %2, %2, %2, %2 in 1 : vector<8x32xf32>, vector<8x32xf32>, vector<8x32xf32>, vector<8x32xf32> -> vector<8x128xf32>
    %c0_4 = arith.constant 0 : index
    %c0_5 = arith.constant 0 : index
    %4 = vector.load %arg4[%c0_4, %c0_5] : memref<8x32xf32, #tpu.memory_space<vmem>>, vector<8x32xf32>
    %5 = tpu.concatenate %4, %4, %4, %4 in 1 : vector<8x32xf32>, vector<8x32xf32>, vector<8x32xf32>, vector<8x32xf32> -> vector<8x128xf32>
    %c0_6 = arith.constant 0 : index
    %c0_7 = arith.constant 0 : index
    %6 = vector.load %arg5[%c0_6, %c0_7] : memref<8x32xf32, #tpu.memory_space<vmem>>, vector<8x32xf32>
    %7 = tpu.concatenate %6, %6, %6, %6 in 1 : vector<8x32xf32>, vector<8x32xf32>, vector<8x32xf32>, vector<8x32xf32> -> vector<8x128xf32>
    %c127_i32 = arith.constant 127 : i32
    %8 = tpu.dynamic_rotate %1 by %c127_i32 dim 1 : vector<8x128xf32>, i32 -> vector<8x128xf32>
    %c1_i32 = arith.constant 1 : i32
    %9 = tpu.dynamic_rotate %1 by %c1_i32 dim 1 : vector<8x128xf32>, i32 -> vector<8x128xf32>
    %10 = arith.mulf %1, %3 : vector<8x128xf32>
    %11 = arith.mulf %8, %5 : vector<8x128xf32>
    %12 = arith.addf %10, %11 : vector<8x128xf32>
    %13 = arith.mulf %9, %7 : vector<8x128xf32>
    %14 = arith.addf %12, %13 : vector<8x128xf32>
    %c0_8 = arith.constant 0 : index
    %c0_9 = arith.constant 0 : index
    %c0_10 = arith.constant 0 : index
    %15 = vector.load %arg6[%c0_8, %c0_9, %c0_10] : memref<1x8x128xf32, #tpu.memory_space<vmem>>, vector<1x8x128xf32>
    %16 = vector.shape_cast %15 : vector<1x8x128xf32> to vector<8x128xf32>
    %17 = vector.shape_cast %14 : vector<8x128xf32> to vector<1x8x128xf32>
    tpu.vector_store %arg6[%c0_8, %c0_9, %c0_10], %17 {strides = array<i32>} : memref<1x8x128xf32, #tpu.memory_space<vmem>>, vector<1x8x128xf32>,
    return
  }
  func.func @transform_0(%arg0: i32, %arg1: i32) -> (i32, i32, i32) {
    %c0_i32 = arith.constant 0 : i32
    %c0_i32_0 = arith.constant 0 : i32
    return %arg1, %arg0, %c0_i32 : i32, i32, i32
  }
  func.func @transform_1(%arg0: i32, %arg1: i32) -> (i32, i32) {
    %c0_i32 = arith.constant 0 : i32
    %c0_i32_0 = arith.constant 0 : i32
    return %arg0, %c0_i32 : i32, i32
  }
  func.func @transform_2(%arg0: i32, %arg1: i32) -> (i32, i32) {
    %c0_i32 = arith.constant 0 : i32
    %c0_i32_0 = arith.constant 0 : i32
    return %arg0, %c0_i32 : i32, i32
  }
  func.func @transform_3(%arg0: i32, %arg1: i32) -> (i32, i32) {
    %c0_i32 = arith.constant 0 : i32
    %c0_i32_0 = arith.constant 0 : i32
    return %arg0, %c0_i32 : i32, i32
  }
  func.func @transform_4(%arg0: i32, %arg1: i32) -> (i32, i32, i32) {
    %c0_i32 = arith.constant 0 : i32
    %c0_i32_0 = arith.constant 0 : i32
    return %arg1, %arg0, %c0_i32 : i32, i32, i32
  }
}

</mosaic_0001>

<bundles_post_ra>
// kernel: tpu_custom_call.1
= control target key start
LH: loop header
LB: loop body
LE: loop exit
PB: predicated region body
PF: predicated region fallthrough
CT: control target
= control target key end

     0   :  { %9 = vsyncpa [#allocation3], 0  ;;  %s1010_s0 = inlined_call_operand.hbm [shape: f32[2,8,128], index: 0, kind: input, shape index: {}]   ;;  %s1011_s1 = inlined_call_operand.hbm [shape: f32[8,32], index: 1, kind: input, shape index: {}]   ;;  %s1012_s2 = inlined_call_operand.hbm [shape: f32[8,32], index: 2, kind: input, shape index: {}]   ;;  %s1013_s3 = inlined_call_operand.hbm [shape: f32[8,32], index: 3, kind: input, shape index: {}]   ;;  %s1014_s4 = inlined_call_operand.hbm [shape: f32[2,8,128], index: 4, kind: output, shape index: {}]  }
   0x1   :  { %11 = vsyncpa [#allocation3 + $0x1], 0 }
   0x2   :  { %12 = vsyncpa [#allocation6], 0 }
   0x3   :  { %13 = vsyncpa [#allocation9], 0 }
   0x4   :  { %14 = vsyncpa [#allocation4], 0 }
   0x5   :  { %16 = vsyncpa [#allocation4 + $0x1], 0  ;;  %s847_s15 = smov 0   ;;  %s849_s16 = smov 0  }
   0x6   :  { %s851_s17 = smov 0   ;;  %s853_s18 = smov 0  }
   0x7   :  { %s855_s19 = smov 0   ;;  %s857_s20 = smov 0  }
   0x8 LB: > { %s485_s21 = sadd.s32 4294967295, %s812_s20   ;;  %s486_s22 = sadd.s32 4294967294, %s812_s20   ;;  %s812_s20 = sphi %s857_s20, %s22_s20   ;;  %s808_s19 = sphi %s855_s19, %s1026_s19   ;;  %s804_s18 = sphi %s853_s18, %s1025_s18   ;;  %s800_s17 = sphi %s851_s17, %s1024_s17   ;;  %s796_s16 = sphi %s849_s16, %s1023_s16   ;;  %s792_s15 = sphi %s847_s15, %s1022_s15  }
   0x9   : > { %p56_p0 = scmp.ne.s32.totalorder %s796_s16, %s792_s15  ;;  %p881_p1 = scmp.eq.s32.totalorder %s485_s21, 0 }
   0xa   : > { %p885_p2 = scmp.eq.s32.totalorder %s485_s21, 1  ;;  %p166_p3 = scmp.eq.s32.totalorder %s486_s22, 1 }
   0xb   : > { %p891_p4 = por %p881_p1, %p56_p0  ;;  %p487_p5 = scmp.ge.s32.totalorder %s812_s20, 1 }
   0xc   : > { %p896_p6 = por %p166_p3, %p56_p0  ;;  %p173_p7 = scmp.lt.s32.totalorder %s812_s20, 3 }
   0xd   : > { %s187_s29 = sshll.u32 %s1011_s1, 4  ;;  %p491_p9 = scmp.ge.s32.totalorder %s812_s20, 2  ;;  %s188_s29 = int_to_ptr.hbm [resolvable:$true] %s187_s29 }
   0xe   : > { %p904_p8 = pnand %p487_p5, %p173_p7  ;;  %s814_s5 = smov [#allocation5]  }
   0xf   : > { %s189_s6 = sshll.u32 %s814_s5, 4  ;;  %s201_s9 = sshll.u32 %s1012_s2, 4  ;;  %s190_s6 = int_to_ptr.vmem [resolvable:$true] %s189_s6  ;;  %s202_s9 = int_to_ptr.hbm [resolvable:$true] %s201_s9 }
  0x10   : > { %p520_p10 = pneg %p904_p8  ;;  %s215_s12 = sshll.u32 %s1013_s3, 4  ;;  %s216_s12 = int_to_ptr.hbm [resolvable:$true] %s215_s12 }
  0x11   : > { %s815_s13 = smov [#allocation7]   ;;  %s816_s21 = smov [#allocation8]  }
  0x12   : > { %p521_p11 = pnand %p520_p10, %p881_p1  ;;  %s203_s14 = sshll.u32 %s815_s13, 4  ;;  %s204_s14 = int_to_ptr.vmem [resolvable:$true] %s203_s14 }
  0x13   : > { %s217_s22 = sshll.u32 %s816_s21, 4  ;;  %s31_s27 = sadd.s32 1, %s808_s19  ;;  %s218_s22 = int_to_ptr.vmem [resolvable:$true] %s217_s22 }
  0x14   : > { %523 = dma.hbm_to_vmem [thread:$0]  (!%p521_p11), %s188_s29, 128, %s190_s6, [#allocation6]  }
  0x15   : > { %526 = dma.hbm_to_vmem [thread:$0]  (!%p521_p11), %s202_s9, 128, %s204_s14, [#allocation6]  }
  0x16   : > { %529 = dma.hbm_to_vmem [thread:$0]  (!%p521_p11), %s216_s12, 128, %s218_s22, [#allocation9]  }
  0x17   : > { %p32_p12 = scmp.ge.s32.totalorder %s31_s27, 2  ;;  %s43_s28 = sadd.s32 1, %s800_s17 }
  0x18   : > { %p50_p13 = scmp.ne.s32.totalorder %s800_s17, %s796_s16  ;;  %p51_p0 = scmp.eq.s32.totalorder %s812_s20, 0 }
  0x19   : > { %s1028_s27 = smov (%p32_p12, %s31_s27), 0  ;;  %p541_p7 = scmp.lt.s32.totalorder %s812_s20, 2 }
  0x1a   : > { %p926_p3 = por %p51_p0, %p50_p13  ;;  %p932_p5 = por %p885_p2, %p50_p13 }
  0x1b   : > { %s38_s6 = ssub.s32 %s808_s19, %s1028_s27  ;;  %s228_s7 = sand.u32 1, %s800_s17  }
  0x1c   : > { %p41_p10 = scmp.eq.s32.totalorder %s38_s6, 0  ;;  %s492_s8 = sshll.u32 %s228_s7, 3 }
  0x1d   : > { %s493_s10 = sshll.u32 %s808_s19, 3  ;;  %s232_s14 = scalar_lea.vmem [#allocation2], %s492_s8 }
  0x1e   : > { %s941_s9 = scalar_select %p41_p10, %s800_s17, %s43_s28  }
  0x1f   : > { %s237_s13 = scalar_lea.hbm %s1010_s0, %s493_s10  ;;  %s241_s21 = sshll.u32 %s232_s14, 4  ;;  %s242_s21 = int_to_ptr.vmem [resolvable:$true] %s241_s21 }
  0x20   : > { %s239_s24 = sshll.u32 %s237_s13, 4  ;;  %p531_p2 = pnand %p541_p7, %p926_p3  ;;  %s240_s24 = int_to_ptr.hbm [resolvable:$true] %s239_s24 }
  0x21   : > { %s229_s22 = scalar_lea.sflag [#allocation3], %s228_s7  ;;  %250 = sbr.rel (%p904_p8) target bundleno = 191 (0xbf), region = 36 }
  0x22   : > { %533 = dma.hbm_to_vmem [thread:$0]  (!%p531_p2), %s240_s24, 128, %s242_s21, %s229_s22  }
  0x23   : > { %s952_s28 = sand.u32 (!%p904_p8), 1, %s796_s16  }
  0x24   : > { %s495_s6 = sshll.u32 (!%p904_p8), %s952_s28, 3  ;;  %s253_s8 = scalar_lea.sflag (!%p904_p8), [#allocation3], %s952_s28 }
  0x25   : > { %s256_s10 = scalar_lea.vmem (!%p904_p8), [#allocation2], %s495_s6 }
  0x26   : > { %775 = dma.done.wait (%p891_p4), %s253_s8, 128  }
  0x27   : > { %777 = vsyncadd (%p891_p4), %s253_s8, 4294967168 }
  0x28   : > { %779 = dma.done.wait (%p881_p1), [#allocation6], 256  }
  0x29   : > { %781 = vsyncadd (%p881_p1), [#allocation6], 4294967040 }
  0x2a   : > { %783 = dma.done.wait (%p881_p1), [#allocation9], 128  }
  0x2b   : > { %785 = vsyncadd (%p881_p1), [#allocation9], 4294967168  ;;  %v298_v0 = vld [vmem:[#allocation5] sm:$0xff]  ;;  %s817_s30 = smov 32   ;;  %s818_s29 = smov 64   ;;  %v315_v1 = vld [vmem:[#allocation7] sm:$0xff] }
  0x2c   : > { %300 = vrot.lane.b32.xlu0 %v298_v0, %s817_s30  ;;  %303 = vrot.lane.b32.xlu1 %v298_v0, %s818_s29  ;;  %s819_s7 = smov 96   ;;  %v329_v2 = vld [vmem:[#allocation8] sm:$0xff]  ;;  %s820_s25 = smov 127   ;;  %vm309_vm0 = vcmask 261120   ;;  %vm311_vm1 = vcmask 523264   ;;  %vm313_vm2 = vcmask 785408  }
  0x2d   : > { %306 = vrot.lane.b32.xlu2 %v298_v0, %s819_s7  ;;  %v297_v3 = vld [vmem:[%s256_s10] sm:$0xff]  ;;  %s821_s23 = smov 1   ;;  %s501_s11 = sshll.u32 %s804_s18, 3 }
  0x2e   : > { %s365_s14 = scalar_lea.hbm %s1014_s4, %s501_s11  ;;  %s296_s21 = scalar_lea.vmem [#allocation10], %s495_s6 }
  0x2f   : > { %s367_s24 = sshll.u32 %s296_s21, 4  ;;  %s369_s22 = sshll.u32 %s365_s14, 4  ;;  %s368_s24 = int_to_ptr.vmem [resolvable:$true] %s367_s24  ;;  %s370_s22 = int_to_ptr.hbm [resolvable:$true] %s369_s22 }
  0x30   : > { %s354_s18 = scalar_lea.sflag [#allocation4], %s952_s28  ;;  %s736_s8 = sshra.s32 %s370_s22, 4  ;;  %s737_s8 = int_to_ptr.hbm [resolvable:$true] %s736_s8 }
  0x31   : > { %s738_s10 = scalar_lea.hbm %s737_s8, 8  ;;  %s742_s6 = scalar_lea.hbm %s1014_s4, 16 }
  0x32   : > { %p739_p1 = scmp.ne.s32.totalorder %s737_s8, %s738_s10  ;;  %p743_p11 = scmp.lt.s32.totalorder %s737_s8, %s1014_s4 }
  0x33   : > { %p744_p12 = scmp.lt.s32.totalorder %s742_s6, %s738_s10 }
  0x34   : > { %317 = vrot.lane.b32.xlu0 %v315_v1, %s817_s30  ;;  %320 = vrot.lane.b32.xlu1 %v315_v1, %s818_s29  ;;  %p740_p4 = pnand %p739_p1, %p932_p5 }
  0x35   : > { %323 = vrot.lane.b32.xlu2 %v315_v1, %s819_s7  ;;  %p745_p13 = por %p744_p12, %p743_p11 }
  0x36   : > { %p741_p8 = pneg %p740_p4 }
  0x38   : > { %p746_p0 = pnand %p745_p13, %p741_p8 }
  0x3c   : > { %331 = vrot.lane.b32.xlu0 %v329_v2, %s817_s30  ;;  %334 = vrot.lane.b32.xlu1 %v329_v2, %s818_s29 }
  0x3d   : > { %343 = vrot.lane.b32.xlu2 %v297_v3, %s820_s25 }
  0x44   : > { %337 = vrot.lane.b32.xlu0 %v329_v2, %s819_s7  ;;  %345 = vrot.lane.b32.xlu1 %v297_v3, %s821_s23 }
  0x87   : > { %v307_v4 = vpop.permute.xlu2 %306 }
  0x8f   : > { %v324_v9 = vpop.permute.xlu2 %323 }
  0x97   : > { %v344_v17 = vpop.permute.xlu2 %343 }
  0x9e   : > { %v301_v5 = vpop.permute.xlu0 %300  ;;  %v304_v6 = vpop.permute.xlu1 %303 }
  0x9f   : > { %v310_v11 = vsel %vm309_vm0, %v298_v0, %v301_v5 }
  0xa0   : > { %v312_v15 = vsel %vm311_vm1, %v310_v11, %v304_v6 }
  0xa1   : > { %v314_v18 = vsel %vm313_vm2, %v312_v15, %v307_v4 }
  0xa2   : > { %v347_v21 = vmul.f32 %v314_v18, %v297_v3 }
  0xa6   : > { %v318_v7 = vpop.permute.xlu0 %317  ;;  %v321_v8 = vpop.permute.xlu1 %320 }
  0xa7   : > { %v326_v10 = vsel %vm309_vm0, %v315_v1, %v318_v7 }
  0xa8   : > { %v327_v12 = vsel %vm311_vm1, %v326_v10, %v321_v8 }
  0xa9   : > { %v328_v16 = vsel %vm313_vm2, %v327_v12, %v324_v9 }
  0xaa   : > { %v348_v20 = vmul.f32 %v344_v17, %v328_v16 }
  0xac   : > { %v349_v26 = vadd.f32 %v348_v20, %v347_v21 }
  0xae   : > { %v332_v13 = vpop.permute.xlu0 %331  ;;  %v335_v14 = vpop.permute.xlu1 %334 }
  0xaf   : > { %v340_v19 = vsel %vm309_vm0, %v329_v2, %v332_v13 }
  0xb0   : > { %v341_v22 = vsel %vm311_vm1, %v340_v19, %v335_v14 }
  0xb6   : > { %v338_v23 = vpop.permute.xlu0 %337  ;;  %v346_v24 = vpop.permute.xlu1 %345 }
  0xb7   : > { %v342_v25 = vsel %vm313_vm2, %v341_v22, %v338_v23 }
  0xb8   : > { %v350_v27 = vmul.f32 %v346_v24, %v342_v25 }
  0xba   : > { %v351_v28 = vadd.f32 %v350_v27, %v349_v26 }
  0xbc   : > { %352 = vst [vmem:[%s296_s21] sm:$0xff] %v351_v28 }
  0xbd   : > { %749 = shalt.err (!%p746_p0)
}
  0xbe   : > { %518 = dma.vmem_to_hbm [thread:$0]  (%p932_p5), %s368_s24, 128, %s370_s22, %s354_s18  }
  0xbf PF: > { %s381_s28 = sand.u32 1, %s792_s15   ;;  %p535_p3 = pnand %p491_p9, %p896_p6 }
  0xc0   : > { %s382_s23 = scalar_lea.sflag [#allocation4], %s381_s28 }
  0xc1   : > { %p536_p7 = pneg %p535_p3 }
  0xc3   : > { %787 = dma.done.wait (%p536_p7), %s382_s23, 128  }
  0xc4   : > { %789 = vsyncadd (%p536_p7), %s382_s23, 4294967168  ;;  %s22_s20 = sadd.s32 1, %s812_s20   ;;  %s1022_s15 = smov %s796_s16 }
  0xc5   : > { %p19_p10 = scmp.ge.s32.totalorder %s22_s20, 4   ;;  %s1023_s16 = smov %s800_s17 }
  0xc6   : > { %s1024_s17 = smov %s941_s9  ;;  %s1025_s18 = smov %s808_s19 }
  0xc7   : > { %s1026_s19 = smov %s1028_s27  ;;  %21 = sbr.rel (!%p19_p10) target bundleno = 8 (0x8), region = 96 }
  0xcc   :  { %388 = vsyncpa [#allocation3], 1 }
  0xcd   :  { %390 = vsyncpa [#allocation3 + $0x1], 1 }
  0xce   :  { %391 = vsyncpa [#allocation6], 1 }
  0xcf   :  { %392 = vsyncpa [#allocation9], 1 }
  0xd0   :  { %393 = vsyncpa [#allocation4], 1 }
  0xd1   :  { %395 = vsyncpa [#allocation4 + $0x1], 1 }

</bundles_post_ra>
